<compile_context>
chip_gen: v7x
topology: tpu7x:2x2x1
jax: 0.10.0
libtpu: 0.0.40
codegen_flags: <defaults>
</compile_context>

<pallas_src>
import jax
import jax.numpy as jnp
from jax.experimental import pallas as pl
from jax.experimental.pallas import tpu as pltpu

N_ENCODE = 6
D_IN = 3 + 3 * 2 * N_ENCODE   # 39
FILTER = 128                  # hidden width
D_OUT = 4                     # rgb + sigma


def nerf_mlp_kernel(x_ref, w1_ref, b1_ref, w2_ref, b2_ref, w3_ref, b3_ref,
                    o_ref):
    # x_ref: (TM, D_IN) bf16 tile of the input. Weights bf16, biases f32.
    x = x_ref[...]

    # layer1 + relu (bf16 MXU, f32 accumulate)
    h1 = jnp.dot(x, w1_ref[...], preferred_element_type=jnp.float32)
    h1 = jnp.maximum(h1 + b1_ref[...], 0.0)

    # layer2 + relu
    h2 = jnp.dot(h1.astype(w2_ref.dtype), w2_ref[...],
                 preferred_element_type=jnp.float32)
    h2 = jnp.maximum(h2 + b2_ref[...], 0.0)

    # layer3 (no activation)
    out = jnp.dot(h2.astype(w3_ref.dtype), w3_ref[...],
                  preferred_element_type=jnp.float32)
    out = out + b3_ref[...]

    o_ref[...] = out.astype(o_ref.dtype)


def nerf_forward(x, params, *, tm=2048):
    """x: (N, D_IN) float32. Returns (N, D_OUT) float32.

    tm: row tile. Default 2048 (sweep 2048-4096 in production); clamped for
    small N. N is padded internally to a multiple of tm and the result sliced
    back, so arbitrary ray counts are supported.
    """
    w1, b1, w2, b2, w3, b3 = params
    N, d_in = x.shape
    assert d_in == D_IN

    # bf16 activations/weights (dominant HBM traffic + bf16-native MXU),
    # f32 biases and f32 accumulation inside the kernel.
    x_bf16 = x.astype(jnp.bfloat16)
    w1c, w2c, w3c = (w.astype(jnp.bfloat16) for w in (w1, w2, w3))
    b1c, b2c, b3c = (b.astype(jnp.float32) for b in (b1, b2, b3))

    # Clamp tile for small inputs; pad rows to a multiple of the tile.
    tm = min(tm, max(8, ((N + 7) // 8) * 8))
    n_pad = pl.cdiv(N, tm) * tm
    if n_pad != N:
        x_bf16 = jnp.pad(x_bf16, ((0, n_pad - N), (0, 0)))

    grid = (n_pad // tm,)

    # Weights/biases: whole-array blocks, resident in VMEM for every grid step.
    full = lambda shape: pl.BlockSpec(shape, lambda i: tuple(0 for _ in shape))

    weight_elems = D_IN * FILTER + FILTER * FILTER + FILTER * D_OUT
    cost = pl.CostEstimate(
        flops=2 * n_pad * (D_IN * FILTER + FILTER * FILTER + FILTER * D_OUT),
        transcendentals=0,
        bytes_accessed=(n_pad * D_IN * 2            # x (bf16)
                        + n_pad * D_OUT * 4         # output (f32)
                        + weight_elems * 2          # weights (bf16)
                        + (2 * FILTER + D_OUT) * 4  # biases (f32)
                        ),
    )

    out = pl.pallas_call(
        nerf_mlp_kernel,
        out_shape=jax.ShapeDtypeStruct((n_pad, D_OUT), jnp.float32),
        grid_spec=pltpu.PrefetchScalarGridSpec(
            num_scalar_prefetch=0,
            grid=grid,
            in_specs=[
                pl.BlockSpec((tm, D_IN), lambda i: (i, 0)),   # x tile (bf16)
                full((D_IN, FILTER)),                         # w1
                full((1, FILTER)),                            # b1
                full((FILTER, FILTER)),                       # w2
                full((1, FILTER)),                            # b2
                full((FILTER, D_OUT)),                        # w3
                full((1, D_OUT)),                             # b3
            ],
            out_specs=pl.BlockSpec((tm, D_OUT), lambda i: (i, 0)),
        ),
        compiler_params=pltpu.CompilerParams(
            dimension_semantics=("parallel",),
            vmem_limit_bytes=32 * 1024 * 1024),
        cost_estimate=cost,
    )(x_bf16, w1c, b1c, w2c, b2c, w3c, b3c)

    return out[:N] if n_pad != N else out


def init_params(key):
    """Deterministic init matching nn.Linear shapes (stored as (in, out))."""
    ks = jax.random.split(key, 6)

    def linear(kw, kb, fan_in, fan_out):
        bound = 1.0 / jnp.sqrt(jnp.float32(fan_in))
        w = jax.random.uniform(kw, (fan_in, fan_out), jnp.float32,
                               minval=-bound, maxval=bound)
        b = jax.random.uniform(kb, (1, fan_out), jnp.float32,
                               minval=-bound, maxval=bound)
        return w, b

    w1, b1 = linear(ks[0], ks[1], D_IN, FILTER)
    w2, b2 = linear(ks[2], ks[3], FILTER, FILTER)
    w3, b3 = linear(ks[4], ks[5], FILTER, D_OUT)
    return (w1, b1, w2, b2, w3, b3)


def reference_forward(x, params):
    w1, b1, w2, b2, w3, b3 = params
    h1 = jnp.maximum(x @ w1 + b1, 0.0)
    h2 = jnp.maximum(h1 @ w2 + b2, 0.0)
    return h2 @ w3 + b3


if __name__ == "__main__":
    key = jax.random.PRNGKey(0)
    k_params, k_x = jax.random.split(key)

    params = init_params(k_params)

    # Small test: N deliberately NOT a multiple of the tile to exercise the
    # wrapper-side padding path; tm=128 gives a multi-step grid. Production
    # callers should leave tm at its default (2048) or sweep 2048-4096.
    N = 300
    x = jax.random.normal(k_x, (N, D_IN), jnp.float32)

    out = nerf_forward(x, params, tm=128)
    out = jax.block_until_ready(out)

    ref = reference_forward(x, params)  # f32 reference
    assert out.shape == (N, D_OUT)
    # bf16 inputs/weights with f32 accumulation -> loosened tolerance.
    assert jnp.allclose(out, ref, atol=5e-2, rtol=5e-2), "mismatch vs reference"

    print("KERNEL_OK")
</pallas_src>

<mosaic_0001>
module attributes {stable_mosaic.version = 11 : i64} {
  func.func @nerf_mlp_kernel(%arg0: i32, %arg1: memref<128x39xbf16, #tpu.memory_space<vmem>>, %arg2: memref<39x128xbf16, #tpu.memory_space<vmem>>, %arg3: memref<1x128xf32, #tpu.memory_space<vmem>>, %arg4: memref<128x128xbf16, #tpu.memory_space<vmem>>, %arg5: memref<1x128xf32, #tpu.memory_space<vmem>>, %arg6: memref<128x4xbf16, #tpu.memory_space<vmem>>, %arg7: memref<1x4xf32, #tpu.memory_space<vmem>>, %arg8: memref<128x4xf32, #tpu.memory_space<vmem>>) attributes {dimension_semantics = [#tpu.dimension_semantics<parallel>], iteration_bounds = array<i64: 3>, scalar_prefetch = 0 : i64, scratch_operands = 0 : i64, tpu.core_type = #tpu.core_type<tc>, window_params = [{transform_indices = @transform_0, window_bounds = array<i64: 128, 39>}, {pipeline_mode = #tpu.pipeline_mode<synchronous>, transform_indices = @transform_1, window_bounds = array<i64: 39, 128>}, {pipeline_mode = #tpu.pipeline_mode<synchronous>, transform_indices = @transform_2, window_bounds = array<i64: 1, 128>}, {pipeline_mode = #tpu.pipeline_mode<synchronous>, transform_indices = @transform_3, window_bounds = array<i64: 128, 128>}, {pipeline_mode = #tpu.pipeline_mode<synchronous>, transform_indices = @transform_4, window_bounds = array<i64: 1, 128>}, {pipeline_mode = #tpu.pipeline_mode<synchronous>, transform_indices = @transform_5, window_bounds = array<i64: 128, 4>}, {pipeline_mode = #tpu.pipeline_mode<synchronous>, transform_indices = @transform_6, window_bounds = array<i64: 1, 4>}, {transform_indices = @transform_7, window_bounds = array<i64: 128, 4>}]} {
    %c0 = arith.constant 0 : index
    %c0_0 = arith.constant 0 : index
    %0 = vector.load %arg1[%c0, %c0_0] : memref<128x39xbf16, #tpu.memory_space<vmem>>, vector<128x39xbf16>
    %c0_1 = arith.constant 0 : index
    %c0_2 = arith.constant 0 : index
    %1 = vector.load %arg2[%c0_1, %c0_2] : memref<39x128xbf16, #tpu.memory_space<vmem>>, vector<39x128xbf16>
    %cst = arith.constant dense<0.000000e+00> : vector<128x128xf32>
    %2 = tpu.matmul %0, %1, %cst {dimension_numbers = #tpu.dot_dimension_numbers<[1], [0], [0], [1], [0, 0, 1, 1], [], []>} : vector<128x39xbf16>, vector<39x128xbf16>, vector<128x128xf32> -> vector<128x128xf32>
    %c0_3 = arith.constant 0 : index
    %c0_4 = arith.constant 0 : index
    %3 = vector.load %arg3[%c0_3, %c0_4] : memref<1x128xf32, #tpu.memory_space<vmem>>, vector<1x128xf32>
    %4 = vector.broadcast %3 : vector<1x128xf32> to vector<128x128xf32>
    %5 = arith.addf %2, %4 : vector<128x128xf32>
    %cst_5 = arith.constant 0.000000e+00 : f32
    %6 = vector.broadcast %cst_5 : f32 to vector<128x128xf32>
    %7 = arith.maximumf %5, %6 : vector<128x128xf32>
    %8 = arith.truncf %7 : vector<128x128xf32> to vector<128x128xbf16>
    %c0_6 = arith.constant 0 : index
    %c0_7 = arith.constant 0 : index
    %9 = vector.load %arg4[%c0_6, %c0_7] : memref<128x128xbf16, #tpu.memory_space<vmem>>, vector<128x128xbf16>
    %cst_8 = arith.constant dense<0.000000e+00> : vector<128x128xf32>
    %10 = tpu.matmul %8, %9, %cst_8 {dimension_numbers = #tpu.dot_dimension_numbers<[1], [0], [0], [1], [0, 0, 1, 1], [], []>} : vector<128x128xbf16>, vector<128x128xbf16>, vector<128x128xf32> -> vector<128x128xf32>
    %c0_9 = arith.constant 0 : index
    %c0_10 = arith.constant 0 : index
    %11 = vector.load %arg5[%c0_9, %c0_10] : memref<1x128xf32, #tpu.memory_space<vmem>>, vector<1x128xf32>
    %12 = vector.broadcast %11 : vector<1x128xf32> to vector<128x128xf32>
    %13 = arith.addf %10, %12 : vector<128x128xf32>
    %cst_11 = arith.constant 0.000000e+00 : f32
    %14 = vector.broadcast %cst_11 : f32 to vector<128x128xf32>
    %15 = arith.maximumf %13, %14 : vector<128x128xf32>
    %16 = arith.truncf %15 : vector<128x128xf32> to vector<128x128xbf16>
    %c0_12 = arith.constant 0 : index
    %c0_13 = arith.constant 0 : index
    %17 = vector.load %arg6[%c0_12, %c0_13] : memref<128x4xbf16, #tpu.memory_space<vmem>>, vector<128x4xbf16>
    %cst_14 = arith.constant dense<0.000000e+00> : vector<128x4xf32>
    %18 = tpu.matmul %16, %17, %cst_14 {dimension_numbers = #tpu.dot_dimension_numbers<[1], [0], [0], [1], [0, 0, 1, 1], [], []>} : vector<128x128xbf16>, vector<128x4xbf16>, vector<128x4xf32> -> vector<128x4xf32>
    %c0_15 = arith.constant 0 : index
    %c0_16 = arith.constant 0 : index
    %19 = vector.load %arg7[%c0_15, %c0_16] : memref<1x4xf32, #tpu.memory_space<vmem>>, vector<1x4xf32>
    %20 = vector.broadcast %19 : vector<1x4xf32> to vector<128x4xf32>
    %21 = arith.addf %18, %20 : vector<128x4xf32>
    %c0_17 = arith.constant 0 : index
    %c0_18 = arith.constant 0 : index
    %22 = vector.load %arg8[%c0_17, %c0_18] : memref<128x4xf32, #tpu.memory_space<vmem>>, vector<128x4xf32>
    tpu.vector_store %arg8[%c0_17, %c0_18], %21 {strides = array<i32>} : memref<128x4xf32, #tpu.memory_space<vmem>>, vector<128x4xf32>,
    return
  }
  func.func @transform_0(%arg0: i32) -> (i32, i32) {
    %c0_i32 = arith.constant 0 : i32
    %c0_i32_0 = arith.constant 0 : i32
    return %arg0, %c0_i32 : i32, i32
  }
  func.func @transform_1(%arg0: i32) -> (i32, i32) {
    %c0_i32 = arith.constant 0 : i32
    %c0_i32_0 = arith.constant 0 : i32
    %c0_i32_1 = arith.constant 0 : i32
    return %c0_i32, %c0_i32_0 : i32, i32
  }
  func.func @transform_2(%arg0: i32) -> (i32, i32) {
    %c0_i32 = arith.constant 0 : i32
    %c0_i32_0 = arith.constant 0 : i32
    %c0_i32_1 = arith.constant 0 : i32
    return %c0_i32, %c0_i32_0 : i32, i32
  }
  func.func @transform_3(%arg0: i32) -> (i32, i32) {
    %c0_i32 = arith.constant 0 : i32
    %c0_i32_0 = arith.constant 0 : i32
    %c0_i32_1 = arith.constant 0 : i32
    return %c0_i32, %c0_i32_0 : i32, i32
  }
  func.func @transform_4(%arg0: i32) -> (i32, i32) {
    %c0_i32 = arith.constant 0 : i32
    %c0_i32_0 = arith.constant 0 : i32
    %c0_i32_1 = arith.constant 0 : i32
    return %c0_i32, %c0_i32_0 : i32, i32
  }
  func.func @transform_5(%arg0: i32) -> (i32, i32) {
    %c0_i32 = arith.constant 0 : i32
    %c0_i32_0 = arith.constant 0 : i32
    %c0_i32_1 = arith.constant 0 : i32
    return %c0_i32, %c0_i32_0 : i32, i32
  }
  func.func @transform_6(%arg0: i32) -> (i32, i32) {
    %c0_i32 = arith.constant 0 : i32
    %c0_i32_0 = arith.constant 0 : i32
    %c0_i32_1 = arith.constant 0 : i32
    return %c0_i32, %c0_i32_0 : i32, i32
  }
  func.func @transform_7(%arg0: i32) -> (i32, i32) {
    %c0_i32 = arith.constant 0 : i32
    %c0_i32_0 = arith.constant 0 : i32
    return %arg0, %c0_i32 : i32, i32
  }
}

</mosaic_0001>

<bundles_post_ra>
// kernel: tpu_custom_call.1
= control target key start
LH: loop header
LB: loop body
LE: loop exit
PB: predicated region body
PF: predicated region fallthrough
CT: control target
= control target key end

     0   :  { %s1215_s24 = smov 0   ;;  %s1344_s0 = inlined_call_operand.vmem [shape: bf16[384,39], index: 0, kind: input, shape index: {}]   ;;  %s1345_s1 = inlined_call_operand.vmem [shape: bf16[39,128], index: 1, kind: input, shape index: {}]   ;;  %s1346_s2 = inlined_call_operand.vmem [shape: f32[1,128], index: 2, kind: input, shape index: {}]   ;;  %s1347_s3 = inlined_call_operand.vmem [shape: bf16[128,128], index: 3, kind: input, shape index: {}]   ;;  %s1348_s4 = inlined_call_operand.vmem [shape: f32[1,128], index: 4, kind: input, shape index: {}]   ;;  %s1349_s5 = inlined_call_operand.vmem [shape: bf16[128,4], index: 5, kind: input, shape index: {}]   ;;  %s1350_s6 = inlined_call_operand.vmem [shape: f32[1,4], index: 6, kind: input, shape index: {}]   ;;  %s1351_s7 = inlined_call_operand.vmem [shape: f32[384,4], index: 7, kind: output, shape index: {}]  }
   0x1 LB: > { %s952_s25 = sadd.s32 4294967295, %s1172_s24   ;;  %p956_p0 = scmp.ge.s32.totalorder %s1172_s24, 1  ;;  %s1172_s24 = sphi %s1215_s24, %s17_s24  }
   0x2   : > { %p238_p1 = scmp.lt.s32.totalorder %s1172_s24, 4 }
   0x4   : > { %p239_p2 = pnand %p956_p0, %p238_p1 }
   0x5   : > { %v1139_v0 = vld [vmem:[%s1345_s1] sm:$0xff] (!%p239_p2)   ;;  %vm391_vm0 = vcmask (!%p239_p2), 1042432   ;;  %v1140_v1 = vld [vmem:[%s1345_s1 + $0x8] sm:$0xff] (!%p239_p2)   ;;  %vm392_vm1 = vcmask (!%p239_p2), 1043456   ;;  %v1141_v2 = vld [vmem:[%s1345_s1 + $0x10] ss:$0 sps:$4 sm:$0xff] (!%p239_p2)  }
   0x6   : > { %242 = sbr.rel (%p239_p2) target bundleno = 704 (0x2c0), region = 48  ;;  %1044 = vmatprep.subr.bf16.mxu0 (!%p239_p2), %v1139_v0  ;;  %s957_s9 = sshll.u32 (!%p239_p2), %s952_s25, 4  ;;  %v1174_v3 = vmov (!%p239_p2), 65535   ;;  %v1150_v5 = vld [vmem:[%s1347_s3] sm:$0xff] (!%p239_p2)   ;;  %v1151_v7 = vld [vmem:[%s1347_s3 + $0x8] sm:$0xff] (!%p239_p2)   ;;  %vm366_vm2 = vcmask (!%p239_p2), 318464  }
   0x7   : > { %1045 = vmatpush3.bf16.msra.mxu0 (!%p239_p2), %v1139_v0  ;;  %v393_v4 = vsel (!%p239_p2), %vm391_vm0, 4294967295, %v1174_v3  ;;  %p271_p3 = scmp.lt.s32.totalorder (!%p239_p2), %s957_s9, 47  ;;  %1066 = vmatprep.subr.bf16.mxu1 (!%p239_p2), %v1150_v5  ;;  %v1152_v9 = vld [vmem:[%s1347_s3 + $0x10] sm:$0xff] (!%p239_p2)   ;;  %v1153_v11 = vld [vmem:[%s1347_s3 + $0x18] sm:$0xff] (!%p239_p2)   ;;  %v1154_v14 = vld [vmem:[%s1347_s3 + $0x20] sm:$0xff] (!%p239_p2)   ;;  %vm879_vm3 = vcmask (!%p239_p2), 31744  }
   0x8   : > { %1046 = vmatprep.subr.bf16.mxu0 (!%p239_p2), %v1140_v1  ;;  %v394_v6 = vsel (!%p239_p2), %vm392_vm1, %v393_v4, 0  ;;  %1067 = vmatpush3.bf16.msra.mxu1 (!%p239_p2), %v1150_v5  ;;  %v1155_v17 = vld [vmem:[%s1347_s3 + $0x28] sm:$0xff] (!%p239_p2)   ;;  %v1156_v21 = vld [vmem:[%s1347_s3 + $0x30] sm:$0xff] (!%p239_p2)   ;;  %v1157_v22 = vld [vmem:[%s1347_s3 + $0x38] sm:$0xff] (!%p239_p2)  }
   0x9   : > { %v396_v8 = vand.u32 (!%p239_p2), %v1141_v2, %v394_v6  ;;  %1068 = vmatprep.subr.bf16.mxu1 (!%p239_p2), %v1151_v7  ;;  %v1158_v23 = vld [vmem:[%s1349_s5] sm:$0xff] (!%p239_p2)   ;;  %v1159_v24 = vld [vmem:[%s1349_s5 + $0x8] sm:$0xff] (!%p239_p2)   ;;  %v1160_v25 = vld [vmem:[%s1349_s5 + $0x10] sm:$0xff] (!%p239_p2)  }
   0xa   : > { %v1161_v26 = vld [vmem:[%s1349_s5 + $0x18] sm:$0xff] (!%p239_p2)   ;;  %v1162_v27 = vld [vmem:[%s1349_s5 + $0x20] sm:$0xff] (!%p239_p2)   ;;  %v1163_v28 = vld [vmem:[%s1349_s5 + $0x28] sm:$0xff] (!%p239_p2)  }
   0xb   : > { %1047 = vmatpush3.bf16.msra.mxu0 (!%p239_p2), %v1140_v1  ;;  %v961_v29 = vld [vmem:[%s1346_s2] ss:$0 sm:$0xff] (!%p239_p2) }
   0xc   : > { %1048 = vmatprep.subr.bf16.mxu0 (!%p239_p2), %v396_v8  ;;  %1069 = vmatpush3.bf16.msra.mxu1 (!%p239_p2), %v1151_v7 }
   0xd   : > { %s1353_s9 = smov (!%p271_p3, %s957_s9), 47  ;;  %1070 = vmatprep.subr.bf16.mxu1 %v1152_v9 }
   0xe   : > { %s958_s14 = sshll.u32 %s1353_s9, 2  ;;  %s960_s30 = sshll.u32 %s1353_s9, 3 }
   0xf   : > { %s274_s17 = scalar_lea.vmem %s1344_s0, %s958_s14  ;;  %1049 = vmatpush3.bf16.msra.mxu0 %v396_v8  ;;  %s1307_s13 = scalar_lea.vmem %s1351_s7, %s960_s30 }
  0x10   : > { %v1142_v10 = vld [vmem:[%s274_s17] sm:$0xff]   ;;  %v1143_v12 = vld [vmem:[%s274_s17 + $0x8] sm:$0xff]   ;;  %v1144_v13 = vld [vmem:[%s274_s17 + $0x10] sm:$0xff]   ;;  %1071 = vmatpush3.bf16.msra.mxu1 %v1152_v9  ;;  %1098 = vmatprep.subr.bf16.mxu0 %v1158_v23 }
  0x11   : > { %1050 = vmatprep.mubr.msk.bf16.mxu0 %vm366_vm2, %v1142_v10  ;;  %1072 = vmatprep.subr.bf16.mxu1 %v1153_v11  ;;  %v1145_v15 = vld [vmem:[%s274_s17 + $0x18] sm:$0xff]   ;;  %v1146_v16 = vld [vmem:[%s274_s17 + $0x20] sm:$0xff]   ;;  %v1147_v18 = vld [vmem:[%s274_s17 + $0x28] sm:$0xff]  }
  0x12   : > { %1051 = vmatmul.mubr.msk.bf16.vlgmr.msra.gmra.mrb[0].mxu0 %vm366_vm2, %v1143_v12  ;;  %v1148_v19 = vld [vmem:[%s274_s17 + $0x30] sm:$0xff]   ;;  %v1149_v20 = vld [vmem:[%s274_s17 + $0x38] sm:$0xff]  }
  0x13   : > { %1054 = vmatprep.mubr.msk.bf16.mxu0 %vm366_vm2, %v1144_v13  ;;  %1099 = vmatpush3.bf16.msra.mxu0 %v1158_v23  ;;  %v1165_v23 = vld [vmem:[%s1349_s5 + $0x38] sm:$0xff]  }
  0x14   : > { %1073 = vmatpush3.bf16.msra.mxu1 %v1153_v11  ;;  %1100 = vmatprep.subr.bf16.mxu0 %v1159_v24 }
  0x15   : > { %1074 = vmatprep.subr.bf16.mxu1 %v1154_v14 }
  0x17   : > { %1101 = vmatpush3.bf16.msra.mxu0 %v1159_v24  ;;  %v981_v24 = vld [vmem:[%s1348_s4] ss:$0 sm:$0xff] }
  0x18   : > { %1075 = vmatpush3.bf16.msra.mxu1 %v1154_v14  ;;  %1102 = vmatprep.subr.bf16.mxu0 %v1160_v25 }
  0x19   : > { %1076 = vmatprep.subr.bf16.mxu1 %v1155_v17 }
  0x1a   : > { %1055 = vmatmul.mubr.msk.bf16.gmra.mrb[4].mxu0 %vm366_vm2, %v1145_v15 }
  0x1b   : > { %1058 = vmatprep.mubr.msk.bf16.mxu0 %vm366_vm2, %v1146_v16  ;;  %1103 = vmatpush3.bf16.msra.mxu0 %v1160_v25 }
  0x1c   : > { %1077 = vmatpush3.bf16.msra.mxu1 %v1155_v17  ;;  %1104 = vmatprep.subr.bf16.mxu0 %v1161_v26 }
  0x1d   : > { %1078 = vmatprep.subr.bf16.mxu1 %v1156_v21 }
  0x1f   : > { %1105 = vmatpush3.bf16.msra.mxu0 %v1161_v26 }
  0x20   : > { %1079 = vmatpush3.bf16.msra.mxu1 %v1156_v21  ;;  %1106 = vmatprep.subr.bf16.mxu0 %v1162_v27 }
  0x21   : > { %1080 = vmatprep.subr.bf16.mxu1 %v1157_v22 }
  0x22   : > { %1059 = vmatmul.mubr.msk.bf16.gmra.mrb[8].mxu0 %vm366_vm2, %v1147_v18 }
  0x23   : > { %1062 = vmatprep.mubr.msk.bf16.mxu0 %vm366_vm2, %v1148_v19  ;;  %1107 = vmatpush3.bf16.msra.mxu0 %v1162_v27 }
  0x24   : > { %1081 = vmatpush3.bf16.msra.mxu1 %v1157_v22  ;;  %1108 = vmatprep.subr.bf16.mxu0 %v1163_v28  ;;  %v1164_v22 = vld [vmem:[%s1349_s5 + $0x30] sm:$0xff]  }
  0x27   : > { %1109 = vmatpush3.bf16.msra.mxu0 %v1163_v28 }
  0x28   : > { %1110 = vmatprep.subr.bf16.mxu0 %v1164_v22 }
  0x2a   : > { %1063 = vmatmul.mubr.msk.bf16.gmra.mrb[12].mxu0 %vm366_vm2, %v1149_v20 }
  0x2b   : > { %1111 = vmatpush3.bf16.msra.mxu0 %v1164_v22 }
  0x2c   : > { %1112 = vmatprep.subr.bf16.mxu0 %v1165_v23 }
  0x2f   : > { %1113 = vmatpush3.bf16.msra.mxu0 %v1165_v23 }
  0xe5   : > { %v1052_v30 = vpop.f32.mrb[0].mxu0 }
  0xe6   : > { %v441_v31 = vadd.f32 %v1052_v30, %v961_v29  ;;  %v432_v32 = vpop.f32.mrb[1].mxu0 }
  0xe7   : > { %v433_v33 = vadd.f32 %v961_v29, %v432_v32  ;;  %v1053_v34 = vpop.f32.mrb[2].mxu0 }
  0xe8   : > { %v444_v35 = vadd.f32 %v1053_v34, %v961_v29  ;;  %v435_v36 = vpop.f32.mrb[3].mxu0  ;;  %v497_v38 = vmax.f32 %v441_v31, 0.0 }
  0xe9   : > { %v436_v37 = vadd.f32 %v961_v29, %v435_v36  ;;  %v495_v40 = vmax.f32 %v433_v33, 0.0 }
  0xea   : > { %v498_v39 = vmax.f32 %v444_v35, 0.0 }
  0xeb   : > { %v496_v41 = vmax.f32 %v436_v37, 0.0 }
  0xec   : > { %v512_v42 = vpack.c.bf16 %v498_v39, %v497_v38 }
  0xed   : > { %v1056_v43 = vpop.f32.mrb[4].mxu0  ;;  %v511_v44 = vpack.c.bf16 %v496_v41, %v495_v40 }
  0xee   : > { %v457_v45 = vadd.f32 %v1056_v43, %v961_v29  ;;  %v448_v46 = vpop.f32.mrb[5].mxu0 }
  0xef   : > { %v449_v47 = vadd.f32 %v961_v29, %v448_v46  ;;  %v1057_v48 = vpop.f32.mrb[6].mxu0  ;;  %1082 = vmatprep.mubr.bf16.mxu1 %v511_v44 }
  0xf0   : > { %v460_v49 = vadd.f32 %v1057_v48, %v961_v29  ;;  %v451_v50 = vpop.f32.mrb[7].mxu0  ;;  %1083 = vmatmul.mubr.bf16.vlgmr.msra.gmra.mrb[0].mxu1 %v512_v42  ;;  %v501_v52 = vmax.f32 %v457_v45, 0.0 }
  0xf1   : > { %v452_v51 = vadd.f32 %v961_v29, %v451_v50  ;;  %v499_v54 = vmax.f32 %v449_v47, 0.0 }
  0xf2   : > { %v502_v53 = vmax.f32 %v460_v49, 0.0 }
  0xf3   : > { %v500_v55 = vmax.f32 %v452_v51, 0.0 }
  0xf4   : > { %v514_v56 = vpack.c.bf16 %v502_v53, %v501_v52 }
  0xf5   : > { %v513_v57 = vpack.c.bf16 %v500_v55, %v499_v54  ;;  %v1060_v58 = vpop.f32.mrb[8].mxu0 }
  0xf6   : > { %v473_v59 = vadd.f32 %v1060_v58, %v961_v29  ;;  %v464_v60 = vpop.f32.mrb[9].mxu0 }
  0xf7   : > { %v465_v61 = vadd.f32 %v961_v29, %v464_v60  ;;  %v1061_v62 = vpop.f32.mrb[10].mxu0  ;;  %1086 = vmatprep.mubr.bf16.mxu1 %v513_v57 }
  0xf8   : > { %v476_v63 = vadd.f32 %v1061_v62, %v961_v29  ;;  %v467_v0 = vpop.f32.mrb[11].mxu0  ;;  %1087 = vmatmul.mubr.bf16.gmra.mrb[4].mxu1 %v514_v56  ;;  %v505_v2 = vmax.f32 %v473_v59, 0.0 }
  0xf9   : > { %v468_v1 = vadd.f32 %v961_v29, %v467_v0  ;;  %v503_v4 = vmax.f32 %v465_v61, 0.0 }
  0xfa   : > { %v506_v3 = vmax.f32 %v476_v63, 0.0 }
  0xfb   : > { %v504_v5 = vmax.f32 %v468_v1, 0.0 }
  0xfc   : > { %v516_v6 = vpack.c.bf16 %v506_v3, %v505_v2 }
  0xfd   : > { %v515_v7 = vpack.c.bf16 %v504_v5, %v503_v4  ;;  %v1064_v8 = vpop.f32.mrb[12].mxu0 }
  0xfe   : > { %v489_v9 = vadd.f32 %v1064_v8, %v961_v29  ;;  %v480_v10 = vpop.f32.mrb[13].mxu0 }
  0xff   : > { %v481_v11 = vadd.f32 %v961_v29, %v480_v10  ;;  %v1065_v12 = vpop.f32.mrb[14].mxu0  ;;  %1090 = vmatprep.mubr.bf16.mxu1 %v515_v7 }
 0x100   : > { %v492_v13 = vadd.f32 %v1065_v12, %v961_v29  ;;  %v483_v14 = vpop.f32.mrb[15].mxu0  ;;  %1091 = vmatmul.mubr.bf16.gmra.mrb[8].mxu1 %v516_v6  ;;  %v509_v16 = vmax.f32 %v489_v9, 0.0 }
 0x101   : > { %v484_v15 = vadd.f32 %v961_v29, %v483_v14  ;;  %v507_v18 = vmax.f32 %v481_v11, 0.0 }
 0x102   : > { %v510_v17 = vmax.f32 %v492_v13, 0.0 }
 0x103   : > { %v508_v19 = vmax.f32 %v484_v15, 0.0 }
 0x104   : > { %v518_v20 = vpack.c.bf16 %v510_v17, %v509_v16  ;;  %v990_v17 = vld [vmem:[%s1350_s6] ss:$0 sm:$0xff] }
 0x105   : > { %v517_v21 = vpack.c.bf16 %v508_v19, %v507_v18 }
 0x107   : > { %1094 = vmatprep.mubr.bf16.mxu1 %v517_v21 }
 0x108   : > { %1095 = vmatmul.mubr.bf16.gmra.mrb[12].mxu1 %v518_v20 }
 0x1c3   : > { %v1084_v25 = vpop.f32.mrb[0].mxu1 }
 0x1c4   : > { %v633_v26 = vadd.f32 %v1084_v25, %v981_v24  ;;  %v624_v27 = vpop.f32.mrb[1].mxu1 }
 0x1c5   : > { %v625_v28 = vadd.f32 %v981_v24, %v624_v27  ;;  %v1085_v29 = vpop.f32.mrb[2].mxu1 }
 0x1c6   : > { %v636_v30 = vadd.f32 %v1085_v29, %v981_v24  ;;  %v627_v31 = vpop.f32.mrb[3].mxu1  ;;  %v689_v33 = vmax.f32 %v633_v26, 0.0 }
 0x1c7   : > { %v628_v32 = vadd.f32 %v981_v24, %v627_v31  ;;  %v687_v35 = vmax.f32 %v625_v28, 0.0 }
 0x1c8   : > { %v690_v34 = vmax.f32 %v636_v30, 0.0 }
 0x1c9   : > { %v688_v36 = vmax.f32 %v628_v32, 0.0 }
 0x1ca   : > { %v704_v37 = vpack.c.bf16 %v690_v34, %v689_v33 }
 0x1cb   : > { %v703_v38 = vpack.c.bf16 %v688_v36, %v687_v35  ;;  %v1088_v39 = vpop.f32.mrb[4].mxu1 }
 0x1cc   : > { %v649_v40 = vadd.f32 %v1088_v39, %v981_v24  ;;  %v640_v41 = vpop.f32.mrb[5].mxu1 }
 0x1cd   : > { %v641_v42 = vadd.f32 %v981_v24, %v640_v41  ;;  %v1089_v43 = vpop.f32.mrb[6].mxu1  ;;  %1114 = vmatprep.mubr.bf16.mxu0 %v703_v38 }
 0x1ce   : > { %v652_v44 = vadd.f32 %v1089_v43, %v981_v24  ;;  %v643_v45 = vpop.f32.mrb[7].mxu1  ;;  %1115 = vmatmul.mubr.bf16.vlgmr.msra.gmra.mrb[16].mxu0 %v704_v37  ;;  %v693_v47 = vmax.f32 %v649_v40, 0.0 }
 0x1cf   : > { %v644_v46 = vadd.f32 %v981_v24, %v643_v45  ;;  %v691_v49 = vmax.f32 %v641_v42, 0.0 }
 0x1d0   : > { %v694_v48 = vmax.f32 %v652_v44, 0.0 }
 0x1d1   : > { %v692_v50 = vmax.f32 %v644_v46, 0.0 }
 0x1d2   : > { %v706_v51 = vpack.c.bf16 %v694_v48, %v693_v47 }
 0x1d3   : > { %v705_v52 = vpack.c.bf16 %v692_v50, %v691_v49  ;;  %v1092_v53 = vpop.f32.mrb[8].mxu1 }
 0x1d4   : > { %v665_v54 = vadd.f32 %v1092_v53, %v981_v24  ;;  %v656_v55 = vpop.f32.mrb[9].mxu1 }
 0x1d5   : > { %v657_v56 = vadd.f32 %v981_v24, %v656_v55  ;;  %v1093_v57 = vpop.f32.mrb[10].mxu1  ;;  %1118 = vmatprep.mubr.bf16.mxu0 %v705_v52 }
 0x1d6   : > { %v668_v58 = vadd.f32 %v1093_v57, %v981_v24  ;;  %v659_v59 = vpop.f32.mrb[11].mxu1  ;;  %1119 = vmatmul.mubr.bf16.gmra.mrb[20].mxu0 %v706_v51  ;;  %v697_v61 = vmax.f32 %v665_v54, 0.0 }
 0x1d7   : > { %v660_v60 = vadd.f32 %v981_v24, %v659_v59  ;;  %v695_v63 = vmax.f32 %v657_v56, 0.0 }
 0x1d8   : > { %v698_v62 = vmax.f32 %v668_v58, 0.0 }
 0x1d9   : > { %v696_v0 = vmax.f32 %v660_v60, 0.0 }
 0x1da   : > { %v708_v1 = vpack.c.bf16 %v698_v62, %v697_v61 }
 0x1db   : > { %v707_v2 = vpack.c.bf16 %v696_v0, %v695_v63  ;;  %v1096_v3 = vpop.f32.mrb[12].mxu1 }
 0x1dc   : > { %v681_v4 = vadd.f32 %v1096_v3, %v981_v24  ;;  %v672_v5 = vpop.f32.mrb[13].mxu1 }
 0x1dd   : > { %v673_v6 = vadd.f32 %v981_v24, %v672_v5  ;;  %v1097_v7 = vpop.f32.mrb[14].mxu1  ;;  %1122 = vmatprep.mubr.bf16.mxu0 %v707_v2 }
 0x1de   : > { %v684_v8 = vadd.f32 %v1097_v7, %v981_v24  ;;  %v675_v9 = vpop.f32.mrb[15].mxu1  ;;  %1123 = vmatmul.mubr.bf16.gmra.mrb[24].mxu0 %v708_v1  ;;  %v701_v11 = vmax.f32 %v681_v4, 0.0 }
 0x1df   : > { %v676_v10 = vadd.f32 %v981_v24, %v675_v9  ;;  %v699_v13 = vmax.f32 %v673_v6, 0.0 }
 0x1e0   : > { %v702_v12 = vmax.f32 %v684_v8, 0.0 }
 0x1e1   : > { %v700_v14 = vmax.f32 %v676_v10, 0.0 }
 0x1e2   : > { %v710_v15 = vpack.c.bf16 %v702_v12, %v701_v11 }
 0x1e3   : > { %v709_v16 = vpack.c.bf16 %v700_v14, %v699_v13 }
 0x1e5   : > { %1126 = vmatprep.mubr.bf16.mxu0 %v709_v16 }
 0x1e6   : > { %1127 = vmatmul.mubr.bf16.gmra.mrb[28].mxu0 %v710_v15 }
 0x2a1   : > { %v1116_v18 = vpop.f32.mrb[16].mxu0 }
 0x2a2   : > { %v825_v19 = vadd.f32 %v1116_v18, %v990_v17  ;;  %v816_v20 = vpop.f32.mrb[17].mxu0 }
 0x2a3   : > { %v817_v21 = vadd.f32 %v990_v17, %v816_v20  ;;  %v1117_v22 = vpop.f32.mrb[18].mxu0 }
 0x2a4   : > { %882 = vst.msk [vmem:[%s1307_s13 + $0x10] sm:$0xff] %vm879_vm3, %v825_v19  ;;  %v828_v23 = vadd.f32 %v1117_v22, %v990_v17  ;;  %v819_v24 = vpop.f32.mrb[19].mxu0 }
 0x2a5   : > { %880 = vst.msk [vmem:[%s1307_s13] sm:$0xff] %vm879_vm3, %v817_v21  ;;  %v820_v25 = vadd.f32 %v990_v17, %v819_v24 }
 0x2a6   : > { %883 = vst.msk [vmem:[%s1307_s13 + $0x18] sm:$0xff] %vm879_vm3, %v828_v23 }
 0x2a7   : > { %881 = vst.msk [vmem:[%s1307_s13 + $0x8] sm:$0xff] %vm879_vm3, %v820_v25 }
 0x2a9   : > { %v1120_v26 = vpop.f32.mrb[20].mxu0 }
 0x2aa   : > { %v841_v27 = vadd.f32 %v1120_v26, %v990_v17  ;;  %v832_v28 = vpop.f32.mrb[21].mxu0 }
 0x2ab   : > { %v833_v29 = vadd.f32 %v990_v17, %v832_v28  ;;  %v1121_v30 = vpop.f32.mrb[22].mxu0 }
 0x2ac   : > { %886 = vst.msk [vmem:[%s1307_s13 + $0x30] sm:$0xff] %vm879_vm3, %v841_v27  ;;  %v844_v31 = vadd.f32 %v1121_v30, %v990_v17  ;;  %v835_v32 = vpop.f32.mrb[23].mxu0 }
 0x2ad   : > { %884 = vst.msk [vmem:[%s1307_s13 + $0x20] sm:$0xff] %vm879_vm3, %v833_v29  ;;  %v836_v33 = vadd.f32 %v990_v17, %v835_v32 }
 0x2ae   : > { %887 = vst.msk [vmem:[%s1307_s13 + $0x38] sm:$0xff] %vm879_vm3, %v844_v31 }
 0x2af   : > { %885 = vst.msk [vmem:[%s1307_s13 + $0x28] sm:$0xff] %vm879_vm3, %v836_v33 }
 0x2b1   : > { %v1124_v34 = vpop.f32.mrb[24].mxu0 }
 0x2b2   : > { %v857_v35 = vadd.f32 %v1124_v34, %v990_v17  ;;  %v848_v36 = vpop.f32.mrb[25].mxu0 }
 0x2b3   : > { %v849_v37 = vadd.f32 %v990_v17, %v848_v36  ;;  %v1125_v38 = vpop.f32.mrb[26].mxu0 }
 0x2b4   : > { %890 = vst.msk [vmem:[%s1307_s13 + $0x50] sm:$0xff] %vm879_vm3, %v857_v35  ;;  %v860_v39 = vadd.f32 %v1125_v38, %v990_v17  ;;  %v851_v40 = vpop.f32.mrb[27].mxu0 }
 0x2b5   : > { %888 = vst.msk [vmem:[%s1307_s13 + $0x40] sm:$0xff] %vm879_vm3, %v849_v37  ;;  %v852_v41 = vadd.f32 %v990_v17, %v851_v40 }
 0x2b6   : > { %891 = vst.msk [vmem:[%s1307_s13 + $0x58] sm:$0xff] %vm879_vm3, %v860_v39 }
 0x2b7   : > { %889 = vst.msk [vmem:[%s1307_s13 + $0x48] sm:$0xff] %vm879_vm3, %v852_v41 }
 0x2b9   : > { %v1128_v42 = vpop.f32.mrb[28].mxu0 }
 0x2ba   : > { %v873_v43 = vadd.f32 %v1128_v42, %v990_v17  ;;  %v864_v44 = vpop.f32.mrb[29].mxu0 }
 0x2bb   : > { %v865_v45 = vadd.f32 %v990_v17, %v864_v44  ;;  %v1129_v46 = vpop.f32.mrb[30].mxu0 }
 0x2bc   : > { %894 = vst.msk [vmem:[%s1307_s13 + $0x70] sm:$0xff] %vm879_vm3, %v873_v43  ;;  %v876_v47 = vadd.f32 %v1129_v46, %v990_v17  ;;  %v867_v48 = vpop.f32.mrb[31].mxu0 }
 0x2bd   : > { %892 = vst.msk [vmem:[%s1307_s13 + $0x60] sm:$0xff] %vm879_vm3, %v865_v45  ;;  %v868_v49 = vadd.f32 %v990_v17, %v867_v48 }
 0x2be   : > { %895 = vst.msk [vmem:[%s1307_s13 + $0x78] sm:$0xff] %vm879_vm3, %v876_v47 }
 0x2bf   : > { %893 = vst.msk [vmem:[%s1307_s13 + $0x68] sm:$0xff] %vm879_vm3, %v868_v49 }
 0x2c0 PF: > { %s17_s24 = sadd.s32 1, %s1172_s24  }
 0x2c1   : > { %p14_p4 = scmp.ge.s32.totalorder %s17_s24, 5  }
 0x2c3   :  { %16 = sbr.rel (!%p14_p4) target bundleno = 1 (0x1), region = 78 }

</bundles_post_ra>
